<compile_context>
chip_gen: v5e
topology: v5e:2x2
jax: 0.10.0
libtpu: 0.0.40
codegen_flags: <defaults>
</compile_context>

<pallas_src>
import functools

import jax
import jax.numpy as jnp
from jax.experimental import pallas as pl
from jax.experimental.pallas import tpu as pltpu


def _round_up(x, m):
    return (x + m - 1) // m * m


def _choose_tiling(num_rows, max_tile_rows=512, target_steps=4):
    """Pick (tile_rows, padded_rows, n_steps).

    tile_rows is a multiple of 8 (sublane), <= max_tile_rows (VMEM ceiling),
    padding waste is bounded by < one tile, and we aim for >= target_steps
    grid steps whenever num_rows permits (pipelining + v7x dual-TC sharding).
    """
    min_tiles = pl.cdiv(num_rows, max_tile_rows)   # respect VMEM ceiling
    max_tiles = pl.cdiv(num_rows, 8)               # >= one sublane group/tile
    n_tiles = min(max(min_tiles, target_steps), max_tiles)
    tile_rows = _round_up(pl.cdiv(num_rows, n_tiles), 8)
    num_rows_p = _round_up(num_rows, tile_rows)
    return tile_rows, num_rows_p, num_rows_p // tile_rows


# ---------------------------------------------------------------------------
# Complex helpers operating on (re, im) pairs; im=None means exactly zero and
# the corresponding VPU terms are dropped at trace time.
# ---------------------------------------------------------------------------
def _cmul(a, b):
    ar, ai = a
    br, bi = b
    re = ar * br
    if ai is not None and bi is not None:
        re = re - ai * bi
        im = ar * bi + ai * br
    elif bi is not None:
        im = ar * bi
    elif ai is not None:
        im = ai * br
    else:
        im = None
    return re, im


def _csub(a, b):
    ar, ai = a
    br, bi = b
    if ai is None and bi is None:
        im = None
    elif ai is None:
        im = -bi
    elif bi is None:
        im = ai
    else:
        im = ai - bi
    return ar - br, im


def _re_mul(a, b):  # Re(a * b)
    ar, ai = a
    br, bi = b
    re = ar * br
    if ai is not None and bi is not None:
        re = re - ai * bi
    return re


def _sigma_loss_kernel(planes_ref, om_ref, out_ref, *, inv_kappa, flat):
    """|1 - Re(det(g)) * inv_kappa / omega| per batch element.

    flat=False: planes_ref is (18, TR, 128) f32, plane 2i = Re(g_i), plane
                2i+1 = Im(g_i) (row-major flattened 3x3), batch dense in
                the (sublane, lane) dims.
    flat=True : planes_ref is (9, TR, 128) f32 — the raw flat prediction;
                hermitianization is done here via static plane indexing.
    om_ref, out_ref: (TR, 128) f32.
    """
    if flat:
        p = [planes_ref[i] for i in range(9)]
        # to_hermitian_vec: Re symmetric from the upper triangle, Im
        # antisymmetric from the strict lower triangle (diag imag == 0).
        m = (
            (p[0], None),  (p[1], -p[3]), (p[2], -p[6]),
            (p[1], p[3]),  (p[4], None),  (p[5], -p[7]),
            (p[2], p[6]),  (p[5], p[7]),  (p[8], None),
        )
    else:
        m = tuple((planes_ref[2 * i], planes_ref[2 * i + 1]) for i in range(9))

    # 3x3 determinant, cofactor expansion along the first row; only the real
    # part of the final products is needed.
    c0 = _csub(_cmul(m[4], m[8]), _cmul(m[5], m[7]))
    c1 = _csub(_cmul(m[3], m[8]), _cmul(m[5], m[6]))
    c2 = _csub(_cmul(m[3], m[7]), _cmul(m[4], m[6]))
    det_re = _re_mul(m[0], c0) - _re_mul(m[1], c1) + _re_mul(m[2], c2)

    # det / omega / kappa == det * (1/kappa) / omega ; divide stays in-kernel
    # (hidden under the DMA), exact to keep rtol=1e-5 parity.
    out_ref[...] = jnp.abs(1.0 - det_re * inv_kappa / om_ref[...])


def _make_planes_spec(nplanes, tile_rows, n_steps):
    shape = (nplanes, tile_rows, 128)
    index_map = lambda i: (0, i, 0)
    # Deeper input pipelining when tiles are small and the grid has several
    # steps (keeps the HBM stream saturated, esp. on v7x). Triple-buffering a
    # <=256-row tile stays well inside every generation's scoped-VMEM budget.
    if n_steps >= 3 and tile_rows <= 256 and hasattr(pl, "Buffered"):
        try:
            return pl.BlockSpec(shape, index_map,
                                pipeline_mode=pl.Buffered(3))
        except TypeError:
            pass
    return pl.BlockSpec(shape, index_map)


def sigma_loss_pallas(y_pred, y_true, *, kappa=1.0, nfold=3.0, flat=False,
                      max_tile_rows=512, target_grid_steps=4):
    nfold = int(nfold)
    kappa = float(kappa)
    assert nfold == 3, "kernel hardcodes the 3x3 determinant (nfold=3)"

    y_pred = jnp.asarray(y_pred)
    b = y_pred.shape[0]

    # ---- lane-dense layout: batch -> (rows, 128) lanes --------------------
    num_rows = pl.cdiv(b, 128)
    tile_rows, num_rows_p, n_steps = _choose_tiling(
        num_rows, max_tile_rows, target_grid_steps)
    pad_b = num_rows_p * 128 - b

    if flat:
        # Ship the raw 9 planes; hermitianization happens inside the kernel.
        nplanes = 9
        planes = y_pred.astype(jnp.float32).reshape(b, 9).T          # (9, B)
    else:
        # Single fused pass: interleave re/im (plane 2i / 2i+1), one transpose.
        nplanes = 18
        yp = y_pred.astype(jnp.complex64)
        planes = jnp.stack((jnp.real(yp), jnp.imag(yp)), axis=-1)
        planes = planes.reshape(b, 18).T                              # (18, B)
    if pad_b:
        planes = jnp.pad(planes, ((0, 0), (0, pad_b)))
    planes = planes.reshape(nplanes, num_rows_p, 128)

    omega = y_true[:, -1].astype(jnp.float32)
    if pad_b:
        # Pad omega with 1.0 so discarded lanes stay finite (no inf/NaN).
        omega = jnp.pad(omega, (0, pad_b), constant_values=1.0)
    omega = omega.reshape(num_rows_p, 128)

    out = pl.pallas_call(
        functools.partial(_sigma_loss_kernel, inv_kappa=1.0 / kappa, flat=flat),
        out_shape=jax.ShapeDtypeStruct((num_rows_p, 128), jnp.float32),
        grid_spec=pltpu.PrefetchScalarGridSpec(
            num_scalar_prefetch=0,
            grid=(n_steps,),
            in_specs=[
                _make_planes_spec(nplanes, tile_rows, n_steps),
                pl.BlockSpec((tile_rows, 128), lambda i: (i, 0)),
            ],
            out_specs=pl.BlockSpec((tile_rows, 128), lambda i: (i, 0)),
        ),
        compiler_params=pltpu.CompilerParams(
            dimension_semantics=("parallel",)),
    )(planes, omega)

    return out.reshape(-1)[:b]  # (B,) float32, matches torch output shape


class SigmaLossPallas:
    """Pallas version of cymetric SigmaLoss (forward(y_pred, y_true))."""

    def __init__(self, kappa=1.0, nfold=3.0, flat=False):
        self.kappa = float(kappa)
        self.nfold = nfold
        self.flat = flat

    def __call__(self, y_pred, y_true):
        return sigma_loss_pallas(
            y_pred, y_true, kappa=self.kappa, nfold=self.nfold, flat=self.flat)


if __name__ == "__main__":
    key = jax.random.PRNGKey(0)
    (k_re, k_im, k_true, k_flat, k_true2,
     k_re3, k_im3, k_true3) = jax.random.split(key, 8)

    # ---- flat=False (module default): y_pred is (B, 3, 3) complex ---------
    B = 8
    y_pred = (jax.random.normal(k_re, (B, 3, 3), jnp.float32)
              + 1j * jax.random.normal(k_im, (B, 3, 3), jnp.float32)
              ).astype(jnp.complex64)
    y_true = jax.random.normal(k_true, (B, 4), jnp.float32)
    y_true = y_true.at[:, -1].set(jnp.abs(y_true[:, -1]) + 0.5)

    out = jax.block_until_ready(SigmaLossPallas(1.0, 3.0, False)(y_pred, y_true))
    ref = jnp.abs(1.0 - jnp.real(jnp.linalg.det(y_pred)) / y_true[:, -1] / 1.0)
    assert out.shape == (B,)
    assert jnp.allclose(out, ref, rtol=1e-5, atol=1e-5), (out, ref)

    # ---- flat=True: y_pred is (B, 9) float, hermitianized in-kernel -------
    B2 = 6
    yp_flat = jax.random.normal(k_flat, (B2, 9), jnp.float32)
    yt2 = jnp.abs(jax.random.normal(k_true2, (B2, 3), jnp.float32)) + 0.5
    out2 = jax.block_until_ready(SigmaLossPallas(2.0, 3.0, True)(yp_flat, yt2))

    t = yp_flat.reshape(-1, 3, 3)
    up = jnp.triu(t)
    low = jnp.tril(t, k=-1)
    h_re = (up + jnp.swapaxes(up, -2, -1)
            - jnp.eye(3, dtype=t.dtype)
            * jnp.diagonal(t, axis1=-2, axis2=-1)[..., :, None])
    h_im = low - jnp.swapaxes(low, -2, -1)
    det2 = jnp.real(jnp.linalg.det((h_re + 1j * h_im).astype(jnp.complex64)))
    ref2 = jnp.abs(1.0 - det2 / yt2[:, -1] / 2.0)
    assert out2.shape == (B2,)
    assert jnp.allclose(out2, ref2, rtol=1e-5, atol=1e-5), (out2, ref2)

    # ---- larger batch: exercises multi-step grid + deeper pipelining ------
    B3 = 4000
    y_pred3 = (jax.random.normal(k_re3, (B3, 3, 3), jnp.float32)
               + 1j * jax.random.normal(k_im3, (B3, 3, 3), jnp.float32)
               ).astype(jnp.complex64)
    y_true3 = jnp.abs(jax.random.normal(k_true3, (B3, 2), jnp.float32)) + 0.5
    out3 = jax.block_until_ready(
        SigmaLossPallas(1.3, 3.0, False)(y_pred3, y_true3))
    ref3 = jnp.abs(1.0 - jnp.real(jnp.linalg.det(y_pred3))
                   / y_true3[:, -1] / 1.3)
    assert out3.shape == (B3,)
    assert jnp.allclose(out3, ref3, rtol=1e-4, atol=1e-3), (
        float(jnp.max(jnp.abs(out3 - ref3))))

    print("KERNEL_OK")
</pallas_src>

<mosaic_0001>
module attributes {stable_mosaic.version = 11 : i64} {
  func.func @_sigma_loss_kernel(%arg0: i32, %arg1: memref<18x8x128xf32, #tpu.memory_space<vmem>>, %arg2: memref<8x128xf32, #tpu.memory_space<vmem>>, %arg3: memref<8x128xf32, #tpu.memory_space<vmem>>) attributes {dimension_semantics = [#tpu.dimension_semantics<parallel>], iteration_bounds = array<i64: 1>, scalar_prefetch = 0 : i64, scratch_operands = 0 : i64, tpu.core_type = #tpu.core_type<tc>, window_params = [{transform_indices = @transform_0, window_bounds = array<i64: 18, 8, 128>}, {transform_indices = @transform_1, window_bounds = array<i64: 8, 128>}, {transform_indices = @transform_2, window_bounds = array<i64: 8, 128>}]} {
    %c0 = arith.constant 0 : index
    %c0_0 = arith.constant 0 : index
    %c0_1 = arith.constant 0 : index
    %0 = vector.load %arg1[%c0, %c0_0, %c0_1] : memref<18x8x128xf32, #tpu.memory_space<vmem>>, vector<1x8x128xf32>
    %1 = vector.shape_cast %0 : vector<1x8x128xf32> to vector<8x128xf32>
    %c1 = arith.constant 1 : index
    %c0_2 = arith.constant 0 : index
    %c0_3 = arith.constant 0 : index
    %2 = vector.load %arg1[%c1, %c0_2, %c0_3] : memref<18x8x128xf32, #tpu.memory_space<vmem>>, vector<1x8x128xf32>
    %3 = vector.shape_cast %2 : vector<1x8x128xf32> to vector<8x128xf32>
    %c2 = arith.constant 2 : index
    %c0_4 = arith.constant 0 : index
    %c0_5 = arith.constant 0 : index
    %4 = vector.load %arg1[%c2, %c0_4, %c0_5] : memref<18x8x128xf32, #tpu.memory_space<vmem>>, vector<1x8x128xf32>
    %5 = vector.shape_cast %4 : vector<1x8x128xf32> to vector<8x128xf32>
    %c3 = arith.constant 3 : index
    %c0_6 = arith.constant 0 : index
    %c0_7 = arith.constant 0 : index
    %6 = vector.load %arg1[%c3, %c0_6, %c0_7] : memref<18x8x128xf32, #tpu.memory_space<vmem>>, vector<1x8x128xf32>
    %7 = vector.shape_cast %6 : vector<1x8x128xf32> to vector<8x128xf32>
    %c4 = arith.constant 4 : index
    %c0_8 = arith.constant 0 : index
    %c0_9 = arith.constant 0 : index
    %8 = vector.load %arg1[%c4, %c0_8, %c0_9] : memref<18x8x128xf32, #tpu.memory_space<vmem>>, vector<1x8x128xf32>
    %9 = vector.shape_cast %8 : vector<1x8x128xf32> to vector<8x128xf32>
    %c5 = arith.constant 5 : index
    %c0_10 = arith.constant 0 : index
    %c0_11 = arith.constant 0 : index
    %10 = vector.load %arg1[%c5, %c0_10, %c0_11] : memref<18x8x128xf32, #tpu.memory_space<vmem>>, vector<1x8x128xf32>
    %11 = vector.shape_cast %10 : vector<1x8x128xf32> to vector<8x128xf32>
    %c6 = arith.constant 6 : index
    %c0_12 = arith.constant 0 : index
    %c0_13 = arith.constant 0 : index
    %12 = vector.load %arg1[%c6, %c0_12, %c0_13] : memref<18x8x128xf32, #tpu.memory_space<vmem>>, vector<1x8x128xf32>
    %13 = vector.shape_cast %12 : vector<1x8x128xf32> to vector<8x128xf32>
    %c7 = arith.constant 7 : index
    %c0_14 = arith.constant 0 : index
    %c0_15 = arith.constant 0 : index
    %14 = vector.load %arg1[%c7, %c0_14, %c0_15] : memref<18x8x128xf32, #tpu.memory_space<vmem>>, vector<1x8x128xf32>
    %15 = vector.shape_cast %14 : vector<1x8x128xf32> to vector<8x128xf32>
    %c8 = arith.constant 8 : index
    %c0_16 = arith.constant 0 : index
    %c0_17 = arith.constant 0 : index
    %16 = vector.load %arg1[%c8, %c0_16, %c0_17] : memref<18x8x128xf32, #tpu.memory_space<vmem>>, vector<1x8x128xf32>
    %17 = vector.shape_cast %16 : vector<1x8x128xf32> to vector<8x128xf32>
    %c9 = arith.constant 9 : index
    %c0_18 = arith.constant 0 : index
    %c0_19 = arith.constant 0 : index
    %18 = vector.load %arg1[%c9, %c0_18, %c0_19] : memref<18x8x128xf32, #tpu.memory_space<vmem>>, vector<1x8x128xf32>
    %19 = vector.shape_cast %18 : vector<1x8x128xf32> to vector<8x128xf32>
    %c10 = arith.constant 10 : index
    %c0_20 = arith.constant 0 : index
    %c0_21 = arith.constant 0 : index
    %20 = vector.load %arg1[%c10, %c0_20, %c0_21] : memref<18x8x128xf32, #tpu.memory_space<vmem>>, vector<1x8x128xf32>
    %21 = vector.shape_cast %20 : vector<1x8x128xf32> to vector<8x128xf32>
    %c11 = arith.constant 11 : index
    %c0_22 = arith.constant 0 : index
    %c0_23 = arith.constant 0 : index
    %22 = vector.load %arg1[%c11, %c0_22, %c0_23] : memref<18x8x128xf32, #tpu.memory_space<vmem>>, vector<1x8x128xf32>
    %23 = vector.shape_cast %22 : vector<1x8x128xf32> to vector<8x128xf32>
    %c12 = arith.constant 12 : index
    %c0_24 = arith.constant 0 : index
    %c0_25 = arith.constant 0 : index
    %24 = vector.load %arg1[%c12, %c0_24, %c0_25] : memref<18x8x128xf32, #tpu.memory_space<vmem>>, vector<1x8x128xf32>
    %25 = vector.shape_cast %24 : vector<1x8x128xf32> to vector<8x128xf32>
    %c13 = arith.constant 13 : index
    %c0_26 = arith.constant 0 : index
    %c0_27 = arith.constant 0 : index
    %26 = vector.load %arg1[%c13, %c0_26, %c0_27] : memref<18x8x128xf32, #tpu.memory_space<vmem>>, vector<1x8x128xf32>
    %27 = vector.shape_cast %26 : vector<1x8x128xf32> to vector<8x128xf32>
    %c14 = arith.constant 14 : index
    %c0_28 = arith.constant 0 : index
    %c0_29 = arith.constant 0 : index
    %28 = vector.load %arg1[%c14, %c0_28, %c0_29] : memref<18x8x128xf32, #tpu.memory_space<vmem>>, vector<1x8x128xf32>
    %29 = vector.shape_cast %28 : vector<1x8x128xf32> to vector<8x128xf32>
    %c15 = arith.constant 15 : index
    %c0_30 = arith.constant 0 : index
    %c0_31 = arith.constant 0 : index
    %30 = vector.load %arg1[%c15, %c0_30, %c0_31] : memref<18x8x128xf32, #tpu.memory_space<vmem>>, vector<1x8x128xf32>
    %31 = vector.shape_cast %30 : vector<1x8x128xf32> to vector<8x128xf32>
    %c16 = arith.constant 16 : index
    %c0_32 = arith.constant 0 : index
    %c0_33 = arith.constant 0 : index
    %32 = vector.load %arg1[%c16, %c0_32, %c0_33] : memref<18x8x128xf32, #tpu.memory_space<vmem>>, vector<1x8x128xf32>
    %33 = vector.shape_cast %32 : vector<1x8x128xf32> to vector<8x128xf32>
    %c17 = arith.constant 17 : index
    %c0_34 = arith.constant 0 : index
    %c0_35 = arith.constant 0 : index
    %34 = vector.load %arg1[%c17, %c0_34, %c0_35] : memref<18x8x128xf32, #tpu.memory_space<vmem>>, vector<1x8x128xf32>
    %35 = vector.shape_cast %34 : vector<1x8x128xf32> to vector<8x128xf32>
    %36 = arith.mulf %17, %33 : vector<8x128xf32>
    %37 = arith.mulf %19, %35 : vector<8x128xf32>
    %38 = arith.subf %36, %37 : vector<8x128xf32>
    %39 = arith.mulf %17, %35 : vector<8x128xf32>
    %40 = arith.mulf %19, %33 : vector<8x128xf32>
    %41 = arith.addf %39, %40 : vector<8x128xf32>
    %42 = arith.mulf %21, %29 : vector<8x128xf32>
    %43 = arith.mulf %23, %31 : vector<8x128xf32>
    %44 = arith.subf %42, %43 : vector<8x128xf32>
    %45 = arith.mulf %21, %31 : vector<8x128xf32>
    %46 = arith.mulf %23, %29 : vector<8x128xf32>
    %47 = arith.addf %45, %46 : vector<8x128xf32>
    %48 = arith.subf %41, %47 : vector<8x128xf32>
    %49 = arith.subf %38, %44 : vector<8x128xf32>
    %50 = arith.mulf %13, %33 : vector<8x128xf32>
    %51 = arith.mulf %15, %35 : vector<8x128xf32>
    %52 = arith.subf %50, %51 : vector<8x128xf32>
    %53 = arith.mulf %13, %35 : vector<8x128xf32>
    %54 = arith.mulf %15, %33 : vector<8x128xf32>
    %55 = arith.addf %53, %54 : vector<8x128xf32>
    %56 = arith.mulf %21, %25 : vector<8x128xf32>
    %57 = arith.mulf %23, %27 : vector<8x128xf32>
    %58 = arith.subf %56, %57 : vector<8x128xf32>
    %59 = arith.mulf %21, %27 : vector<8x128xf32>
    %60 = arith.mulf %23, %25 : vector<8x128xf32>
    %61 = arith.addf %59, %60 : vector<8x128xf32>
    %62 = arith.subf %55, %61 : vector<8x128xf32>
    %63 = arith.subf %52, %58 : vector<8x128xf32>
    %64 = arith.mulf %13, %29 : vector<8x128xf32>
    %65 = arith.mulf %15, %31 : vector<8x128xf32>
    %66 = arith.subf %64, %65 : vector<8x128xf32>
    %67 = arith.mulf %13, %31 : vector<8x128xf32>
    %68 = arith.mulf %15, %29 : vector<8x128xf32>
    %69 = arith.addf %67, %68 : vector<8x128xf32>
    %70 = arith.mulf %17, %25 : vector<8x128xf32>
    %71 = arith.mulf %19, %27 : vector<8x128xf32>
    %72 = arith.subf %70, %71 : vector<8x128xf32>
    %73 = arith.mulf %17, %27 : vector<8x128xf32>
    %74 = arith.mulf %19, %25 : vector<8x128xf32>
    %75 = arith.addf %73, %74 : vector<8x128xf32>
    %76 = arith.subf %69, %75 : vector<8x128xf32>
    %77 = arith.subf %66, %72 : vector<8x128xf32>
    %78 = arith.mulf %1, %49 : vector<8x128xf32>
    %79 = arith.mulf %3, %48 : vector<8x128xf32>
    %80 = arith.subf %78, %79 : vector<8x128xf32>
    %81 = arith.mulf %5, %63 : vector<8x128xf32>
    %82 = arith.mulf %7, %62 : vector<8x128xf32>
    %83 = arith.subf %81, %82 : vector<8x128xf32>
    %84 = arith.subf %80, %83 : vector<8x128xf32>
    %85 = arith.mulf %9, %77 : vector<8x128xf32>
    %86 = arith.mulf %11, %76 : vector<8x128xf32>
    %87 = arith.subf %85, %86 : vector<8x128xf32>
    %88 = arith.addf %84, %87 : vector<8x128xf32>
    %cst = arith.constant 1.000000e+00 : f32
    %89 = vector.broadcast %cst : f32 to vector<8x128xf32>
    %90 = arith.mulf %88, %89 : vector<8x128xf32>
    %c0_36 = arith.constant 0 : index
    %c0_37 = arith.constant 0 : index
    %91 = vector.load %arg2[%c0_36, %c0_37] : memref<8x128xf32, #tpu.memory_space<vmem>>, vector<8x128xf32>
    %92 = arith.divf %90, %91 : vector<8x128xf32>
    %cst_38 = arith.constant 1.000000e+00 : f32
    %93 = vector.broadcast %cst_38 : f32 to vector<8x128xf32>
    %94 = arith.subf %93, %92 : vector<8x128xf32>
    %95 = math.absf %94 : vector<8x128xf32>
    %c0_39 = arith.constant 0 : index
    %c0_40 = arith.constant 0 : index
    %96 = vector.load %arg3[%c0_39, %c0_40] : memref<8x128xf32, #tpu.memory_space<vmem>>, vector<8x128xf32>
    tpu.vector_store %arg3[%c0_39, %c0_40], %95 {strides = array<i32>} : memref<8x128xf32, #tpu.memory_space<vmem>>, vector<8x128xf32>,
    return
  }
  func.func @transform_0(%arg0: i32) -> (i32, i32, i32) {
    %c0_i32 = arith.constant 0 : i32
    %c0_i32_0 = arith.constant 0 : i32
    %c0_i32_1 = arith.constant 0 : i32
    return %c0_i32, %arg0, %c0_i32_0 : i32, i32, i32
  }
  func.func @transform_1(%arg0: i32) -> (i32, i32) {
    %c0_i32 = arith.constant 0 : i32
    %c0_i32_0 = arith.constant 0 : i32
    return %arg0, %c0_i32 : i32, i32
  }
  func.func @transform_2(%arg0: i32) -> (i32, i32) {
    %c0_i32 = arith.constant 0 : i32
    %c0_i32_0 = arith.constant 0 : i32
    return %arg0, %c0_i32 : i32, i32
  }
}

</mosaic_0001>

<bundles_post_ra>
// kernel: tpu_custom_call.1
= control target key start
LH: loop header
LB: loop body
LE: loop exit
PB: predicated region body
PF: predicated region fallthrough
CT: control target
= control target key end

     0   :  { %7 = vsyncpa [#allocation3], 0  ;;  %s281_s0 = inlined_call_operand.hbm [shape: f32[18,8,128], index: 0, kind: input, shape index: {}]   ;;  %s282_s1 = inlined_call_operand.hbm [shape: f32[8,128], index: 1, kind: input, shape index: {}]   ;;  %s283_s2 = inlined_call_operand.hbm [shape: f32[8,128], index: 2, kind: output, shape index: {}]  }
   0x1   :  { %8 = vsyncpa [#allocation6], 0 }
   0x2   :  { %9 = vsyncpa [#allocation4], 0  ;;  %s14_s11 = sshll.u32 %s281_s0, 4  ;;  %s252_s12 = smov [#allocation2]   ;;  %s15_s11 = int_to_ptr.hbm [resolvable:$true] %s14_s11 }
   0x3   :  { %s16_s13 = sshll.u32 %s252_s12, 4  ;;  %s28_s16 = sshll.u32 %s282_s1, 4  ;;  %s17_s13 = int_to_ptr.vmem [resolvable:$true] %s16_s13  ;;  %s29_s16 = int_to_ptr.hbm [resolvable:$true] %s28_s16 }
   0x4   :  { %s253_s17 = smov 128   ;;  %s254_s18 = smov 8  }
   0x5   :  { %22 = dma.hbm_to_vmem [thread:$0]  %s15_s11, 2304, %s17_s13, [#allocation3], %s253_s17, %s253_s17, %s254_s18  }
   0x6   :  { %s255_s19 = smov [#allocation5]  }
   0x7   :  { %s30_s20 = sshll.u32 %s255_s19, 4  ;;  %s31_s20 = int_to_ptr.vmem [resolvable:$true] %s30_s20 }
   0x8   :  { %33 = dma.hbm_to_vmem [thread:$0]  %s29_s16, 128, %s31_s20, [#allocation6]  }
   0x9   :  { %246 = dma.done.wait [#allocation3], 2304  }
   0xa   :  { %247 = vsyncadd [#allocation3], 4294964992 }
   0xb   :  { %248 = dma.done.wait [#allocation6], 128  }
   0xc   :  { %249 = vsyncadd [#allocation6], 4294967168  ;;  %v54_v0 = vld [vmem:[#allocation2 + $0x30] sm:$0xff]  ;;  %v56_v1 = vld [vmem:[#allocation2 + $0x38] sm:$0xff]  ;;  %s256_s0 = smov [#allocation7]   ;;  %s156_s23 = sshll.u32 %s283_s2, 4  ;;  %s157_s23 = int_to_ptr.hbm [resolvable:$true] %s156_s23 }
   0xd   :  { %v58_v2 = vld [vmem:[#allocation2 + $0x40] sm:$0xff]  ;;  %v60_v3 = vld [vmem:[#allocation2 + $0x48] sm:$0xff]  ;;  %v62_v4 = vld [vmem:[#allocation2 + $0x50] sm:$0xff]  ;;  %s154_s1 = sshll.u32 %s256_s0, 4  ;;  %s155_s1 = int_to_ptr.vmem [resolvable:$true] %s154_s1 }
   0xe   :  { %v64_v5 = vld [vmem:[#allocation2 + $0x58] sm:$0xff]  ;;  %v66_v6 = vld [vmem:[#allocation2 + $0x60] sm:$0xff]  ;;  %v68_v7 = vld [vmem:[#allocation2 + $0x68] sm:$0xff] }
   0xf   :  { %v70_v8 = vld [vmem:[#allocation2 + $0x70] sm:$0xff]  ;;  %v72_v9 = vld [vmem:[#allocation2 + $0x78] sm:$0xff]  ;;  %v74_v10 = vld [vmem:[#allocation2 + $0x80] sm:$0xff]  ;;  %v97_v14 = vmul.f32 %v66_v6, %v62_v4  ;;  %v98_v15 = vmul.f32 %v68_v7, %v64_v5  ;;  %v100_v33 = vmul.f32 %v68_v7, %v62_v4  ;;  %v101_v34 = vmul.f32 %v66_v6, %v64_v5 }
  0x10   :  { %v76_v11 = vld [vmem:[#allocation2 + $0x88] sm:$0xff]  ;;  %v83_v12 = vmul.f32 %v70_v8, %v62_v4  ;;  %v87_v13 = vmul.f32 %v70_v8, %v64_v5  ;;  %v77_v16 = vmul.f32 %v74_v10, %v58_v2  ;;  %v81_v19 = vmul.f32 %v74_v10, %v60_v3  ;;  %v42_v40 = vld [vmem:[#allocation2] sm:$0xff]  ;;  %v130_v45 = vld [vmem:[#allocation5] sm:$0xff] }
  0x11   :  { %v78_v17 = vmul.f32 %v76_v11, %v60_v3  ;;  %v80_v18 = vmul.f32 %v76_v11, %v58_v2  ;;  %v84_v20 = vmul.f32 %v72_v9, %v64_v5  ;;  %v86_v21 = vmul.f32 %v72_v9, %v62_v4  ;;  %v44_v46 = vld [vmem:[#allocation2 + $0x8] sm:$0xff]  ;;  %v46_v47 = vld [vmem:[#allocation2 + $0x10] sm:$0xff]  ;;  %v48_v48 = vld [vmem:[#allocation2 + $0x18] sm:$0xff] }
  0x12   :  { %v91_v22 = vmul.f32 %v74_v10, %v54_v0  ;;  %v92_v23 = vmul.f32 %v76_v11, %v56_v1  ;;  %v94_v26 = vmul.f32 %v76_v11, %v54_v0  ;;  %v95_v27 = vmul.f32 %v74_v10, %v56_v1  ;;  %v50_v61 = vld [vmem:[#allocation2 + $0x20] sm:$0xff]  ;;  %v52_v62 = vld [vmem:[#allocation2 + $0x28] sm:$0xff] }
  0x13   :  { %v79_v24 = vsub.f32 %v77_v16, %v78_v17  ;;  %v82_v25 = vadd.f32 %v81_v19, %v80_v18  ;;  %v85_v28 = vsub.f32 %v83_v12, %v84_v20  ;;  %v88_v29 = vadd.f32 %v87_v13, %v86_v21 }
  0x14   :  { %v93_v30 = vsub.f32 %v91_v22, %v92_v23  ;;  %v99_v31 = vsub.f32 %v97_v14, %v98_v15  ;;  %v96_v32 = vadd.f32 %v95_v27, %v94_v26  ;;  %v105_v35 = vmul.f32 %v70_v8, %v54_v0 }
  0x15   :  { %v89_v36 = vsub.f32 %v82_v25, %v88_v29  ;;  %v90_v37 = vsub.f32 %v79_v24, %v85_v28  ;;  %v106_v39 = vmul.f32 %v72_v9, %v56_v1  ;;  %v102_v41 = vadd.f32 %v101_v34, %v100_v33 }
  0x16   :  { %v104_v38 = vsub.f32 %v93_v30, %v99_v31  ;;  %v108_v42 = vmul.f32 %v72_v9, %v54_v0  ;;  %v109_v43 = vmul.f32 %v70_v8, %v56_v1  ;;  %v111_v44 = vmul.f32 %v66_v6, %v58_v2 }
  0x17   :  { %v107_v49 = vsub.f32 %v105_v35, %v106_v39  ;;  %v112_v50 = vmul.f32 %v68_v7, %v60_v3  ;;  %v114_v51 = vmul.f32 %v68_v7, %v58_v2  ;;  %v115_v52 = vmul.f32 %v66_v6, %v60_v3 }
  0x18   :  { %v103_v53 = vsub.f32 %v96_v32, %v102_v41  ;;  %v110_v54 = vadd.f32 %v109_v43, %v108_v42  ;;  %172 = vrcp.f32 %v130_v45  ;;  %v119_v57 = vmul.f32 %v90_v37, %v42_v40 }
  0x19   :  { %v113_v55 = vsub.f32 %v111_v44, %v112_v50  ;;  %v116_v56 = vadd.f32 %v115_v52, %v114_v51  ;;  %v120_v58 = vmul.f32 %v89_v36, %v44_v46  ;;  %v122_v59 = vmul.f32 %v104_v38, %v46_v47 }
  0x1a   :  { %v123_v60 = vmul.f32 %v103_v53, %v48_v48  ;;  %vm136_vm0 = vweird.f32 %v130_v45  ;;  %v140_v3 = vand.u32 2147483647, %v130_v45  ;;  %v142_v6 = vand.u32 2147483648, %v130_v45 }
  0x1b   :  { %v117_v63 = vsub.f32 %v110_v54, %v116_v56  ;;  %v118_v0 = vsub.f32 %v107_v49, %v113_v55  ;;  %v121_v1 = vsub.f32 %v119_v57, %v120_v58 }
  0x1c   :  { %v124_v4 = vsub.f32 %v122_v59, %v123_v60  ;;  %v143_v13 = vor.u32 1.1754944e-38, %v142_v6  ;;  %vm141_vm3 = vcmp.eq.f32.partialorder %v140_v3, 8.507059e+37 }
  0x1d   :  { %v126_v5 = vmul.f32 %v118_v0, %v50_v61  ;;  %v127_v8 = vmul.f32 %v117_v63, %v52_v62 }
  0x1e   :  { %v173_v9 = vpop.eup %172  ;;  %v125_v7 = vsub.f32 %v121_v1, %v124_v4 }
  0x1f   :  { %v132_v2 = vmul.f32 %v173_v9, %v130_v45  ;;  %v128_v10 = vsub.f32 %v126_v5, %v127_v8  ;;  %vm137_vm1 = vweird.f32 %v173_v9 }
  0x20   :  { %vm138_vm2 = vmor %vm136_vm0, %vm137_vm1 }
  0x21   :  { %v133_v11 = vsub.f32 1.0, %v132_v2  ;;  %v129_v14 = vadd.f32 %v128_v10, %v125_v7 }
  0x23   :  { %v134_v12 = vmul.f32 %v173_v9, %v133_v11 }
  0x25   :  { %v135_v15 = vadd.f32 %v173_v9, %v134_v12 }
  0x27   :  { %v139_v16 = vsel %vm138_vm2, %v173_v9, %v135_v15 }
  0x28   :  { %v144_v17 = vsel %vm141_vm3, %v143_v13, %v139_v16 }
  0x29   :  { %v145_v18 = vmul.f32 %v144_v17, %v129_v14 }
  0x2b   :  { %v146_v19 = vsub.f32 1.0, %v145_v18 }
  0x2d   :  { %v147_v20 = vand.u32 2147483647, %v146_v19 }
  0x2f   :  { %148 = vst [vmem:[#allocation7] sm:$0xff] %v147_v20 }
  0x30   :  { %159 = dma.vmem_to_hbm [thread:$0]  %s155_s1, 128, %s157_s23, [#allocation4]  }
  0x31   :  { %250 = dma.done.wait [#allocation4], 128  }
  0x32   :  { %251 = vsyncadd [#allocation4], 4294967168 }
  0x33   :  { %164 = vsyncpa [#allocation3], 1 }
  0x34   :  { %165 = vsyncpa [#allocation6], 1 }
  0x35   :  { %166 = vsyncpa [#allocation4], 1 }

</bundles_post_ra>
